<compile_context>
chip_gen: v7x
topology: tpu7x:2x2x1
jax: 0.10.0
libtpu: 0.0.40
codegen_flags: <defaults>
</compile_context>

<pallas_src>
import functools

import jax
import jax.numpy as jnp
import numpy as np
from jax.experimental import pallas as pl
from jax.experimental.pallas import tpu as pltpu


def _round_up(x, m):
    return (x + m - 1) // m * m


def _lgm_kernel(alpha, feat_ref, lab_ref, sloglab_ref, icT_ref, wcT_ref,
                bias_ref, logits_ref, mlogits_ref):
    feat = feat_ref[...]                        # [TB, Dp] f32 (zero-padded)
    lab = lab_ref[...]                          # [TB, 1]  int32
    slog_lab = sloglab_ref[...]                 # [TB, 1]  f32  (slog_covs[label])
    bias = bias_ref[...]                        # [1, Cp]  f32  (-0.5*(slog+c2); padded -> -5e29)

    mm_dtype = icT_ref.dtype                    # bf16 by default (f32 optional)
    f2 = feat * feat                            # squared in f32, then cast

    # z[b,c] = -0.5*(slog[c] + dist[b,c])
    #        = f2 @ (-0.5*invcov)^T + feat @ (centers*invcov)^T + bias
    z = (jnp.dot(f2.astype(mm_dtype), icT_ref[...],
                 preferred_element_type=jnp.float32)
         + jnp.dot(feat.astype(mm_dtype), wcT_ref[...],
                   preferred_element_type=jnp.float32)
         + bias)                                # [TB, Cp] f32

    tb, cp = z.shape
    col = jax.lax.broadcasted_iota(jnp.int32, (tb, cp), 1)
    mask = col == lab                           # [TB, Cp] label one-hot mask

    # --- shared softmax statistics over the NON-label columns (single pass) ---
    z_nl = jnp.where(mask, -jnp.inf, z)                          # label col masked out
    m_nl = jnp.max(z_nl, axis=1, keepdims=True)                  # finite (C >= 2)
    t = jnp.sum(jnp.exp(z_nl - m_nl), axis=1, keepdims=True)     # >= 1
    log_t = jnp.log(t)
    z_lab = jnp.sum(jnp.where(mask, z, 0.0), axis=1, keepdims=True)

    # margin pre-activation differs from z only at the label column:
    #   zm_lab = -0.5*(slog_lab + (1+alpha)*dist_lab)
    #          = (1+alpha)*z_lab + 0.5*alpha*slog_lab
    zm_lab = (1.0 + alpha) * z_lab + (0.5 * alpha) * slog_lab
    zm = jnp.where(mask, zm_lab, z)

    def _lse2(a, b):                            # log(exp(a) + exp(b)), robust
        mx = jnp.maximum(a, b)
        return mx + jnp.log(jnp.exp(a - mx) + jnp.exp(b - mx))

    m_z = jnp.maximum(m_nl, z_lab)
    logits_ref[...] = (z - m_z) - _lse2(m_nl - m_z + log_t, z_lab - m_z)

    m_zm = jnp.maximum(m_nl, zm_lab)
    mlogits_ref[...] = (zm - m_zm) - _lse2(m_nl - m_zm + log_t, zm_lab - m_zm)


def lgm_loss_forward(feat, label, centers, log_covs, alpha, *,
                     use_bf16_matmul=True):
    feat = feat.astype(jnp.float32)
    centers = centers.astype(jnp.float32)
    log_covs = log_covs.astype(jnp.float32)
    label = label.astype(jnp.int32).reshape(-1)

    B, D = feat.shape
    C = centers.shape[0]

    LANE = 128
    Dp = _round_up(D, LANE)
    Cp = _round_up(C, LANE)

    # --- B tiling: fit a ~24 MiB double-buffered streaming budget, and keep
    # >= 2 grid steps when the batch allows it (megacore / pipeline overlap).
    per_row = 2 * (Dp * 4 + 8 + 2 * Cp * 4)     # dbl-buffered feat + labels + 2 outs
    tb_cap = max(8, min(512, (24 * 1024 * 1024 // per_row) // 8 * 8))
    TB = min(tb_cap, _round_up(B, 8))
    if B > 8 and _round_up(B, TB) // TB < 2:
        TB = max(8, _round_up((B + 1) // 2, 8))
    Bp = _round_up(B, TB)
    nt = Bp // TB

    # --- center-side invariants: computed once, constants folded in ---
    inv_covs = jnp.exp(-log_covs)               # [C, D]
    wc = centers * inv_covs                     # [C, D]
    slog = jnp.sum(log_covs, axis=-1)           # [C]
    c2 = jnp.sum(centers * wc, axis=-1)         # [C]
    bias = -0.5 * (slog + c2)                   # [C]

    BIG = 1e30  # padded classes: z ~ -5e29 -> exp underflows (strictly f32)

    def pad2(x, r, c):
        return jnp.pad(x, ((0, r - x.shape[0]), (0, c - x.shape[1])))

    mm_dtype = jnp.bfloat16 if use_bf16_matmul else jnp.float32
    icT = pad2(-0.5 * inv_covs, Cp, Dp).T.astype(mm_dtype)     # [Dp, Cp]
    wcT = pad2(wc, Cp, Dp).T.astype(mm_dtype)                  # [Dp, Cp]
    bias_p = jnp.pad(bias, (0, Cp - C),
                     constant_values=-0.5 * BIG).reshape(1, Cp)

    feat_p = pad2(feat, Bp, Dp)                                # [Bp, Dp]
    lab_p = jnp.pad(label, (0, Bp - B)).reshape(Bp, 1)         # [Bp, 1] int32
    sloglab_p = jnp.pad(slog[label], (0, Bp - B)).reshape(Bp, 1)

    kernel = functools.partial(_lgm_kernel, float(alpha))

    # rough VMEM need (dbl-buffered tiles + invariants) -> compiler limit
    op_bytes = 2 if use_bf16_matmul else 4
    est = (2 * TB * (Dp * 4 + 8 + 2 * Cp * 4)
           + 2 * (2 * Dp * Cp * op_bytes + Cp * 4))
    vmem_limit = int(min(100 * 2**20, max(32 * 2**20, 2 * est)))

    logits_p, mlogits_p = pl.pallas_call(
        kernel,
        out_shape=(jax.ShapeDtypeStruct((Bp, Cp), jnp.float32),
                   jax.ShapeDtypeStruct((Bp, Cp), jnp.float32)),
        grid=(nt,),
        in_specs=[
            pl.BlockSpec((TB, Dp), lambda i: (i, 0)),   # feat tile
            pl.BlockSpec((TB, 1), lambda i: (i, 0)),    # label column
            pl.BlockSpec((TB, 1), lambda i: (i, 0)),    # slog[label] column
            pl.BlockSpec((Dp, Cp), lambda i: (0, 0)),   # -0.5*invcov^T (block-invariant)
            pl.BlockSpec((Dp, Cp), lambda i: (0, 0)),   # (c*invcov)^T  (block-invariant)
            pl.BlockSpec((1, Cp), lambda i: (0, 0)),    # bias
        ],
        out_specs=(pl.BlockSpec((TB, Cp), lambda i: (i, 0)),
                   pl.BlockSpec((TB, Cp), lambda i: (i, 0))),
        compiler_params=pltpu.CompilerParams(
            dimension_semantics=("parallel",),
            vmem_limit_bytes=vmem_limit),
    )(feat_p, lab_p, sloglab_p, icT, wcT, bias_p)

    logits = logits_p[:B, :C]
    margin_logits = mlogits_p[:B, :C]

    # cdist / batch_det / reg / likelihood: trivial gathers, kept outside the
    # kernel (reference semantics: likelihood = (cdist - reg)/B,
    # reg = 0.5*(batch_det + 1e-8)).
    cdiff = feat - centers[label]
    cdist = 0.5 * jnp.sum(cdiff * cdiff)
    batch_det = jnp.sum(slog[label])
    reg = 0.5 * (batch_det + 1e-8)
    likelihood = (cdist - reg) / B
    return logits, margin_logits, likelihood, cdist, reg


def _reference(feat, label, centers, log_covs, alpha):
    """Pure-JAX broadcast reference mirroring the PyTorch forward."""
    covs = jnp.exp(log_covs)                                    # [C, D]
    diff = feat[:, None, :] - centers[None, :, :]               # [B, C, D]
    dist = jnp.sum(diff * diff / covs[None], axis=-1)           # [B, C]
    onehot = jax.nn.one_hot(label, centers.shape[0], dtype=feat.dtype)
    y = 1.0 + alpha * onehot
    slog = jnp.sum(log_covs, axis=-1)                           # [C]
    margin_logits = jax.nn.log_softmax(-0.5 * (slog[None] + dist * y), axis=1)
    logits = jax.nn.log_softmax(-0.5 * (slog[None] + dist), axis=1)
    cdiff = feat - centers[label]
    cdist = jnp.sum(cdiff * cdiff) / 2.0
    batch_det = jnp.sum(slog[label])
    reg = 0.5 * (batch_det + 1e-8)
    likelihood = (cdist - reg) / feat.shape[0]
    return logits, margin_logits, likelihood, cdist, reg


if __name__ == "__main__":
    # small shapes consistent with the module: batch=8, feat_dim=32, classes=16
    B, D, C = 8, 32, 16
    alpha = 1.0  # hyper_args.gmm_alpha

    key = jax.random.PRNGKey(0)
    k_feat, k_lab, k_mean, k_var = jax.random.split(key, 4)

    feat = jax.random.normal(k_feat, (B, D), dtype=jnp.float32)
    label = jax.random.randint(k_lab, (B,), 0, C, dtype=jnp.int32)

    # deterministic parameter init mirroring __init__:
    #   centers  <- initial_means
    #   log_covs <- log(initial_vars ** 2)
    initial_means = 0.5 * jax.random.normal(k_mean, (C, D), dtype=jnp.float32)
    initial_vars = jax.random.uniform(k_var, (C, D), dtype=jnp.float32,
                                      minval=0.5, maxval=1.5)
    centers = initial_means
    log_covs = jnp.log(initial_vars ** 2)

    # --- f32-MXU path: tight numerical check vs the broadcast reference ---
    outs32 = lgm_loss_forward(feat, label, centers, log_covs, alpha,
                              use_bf16_matmul=False)
    outs32 = jax.block_until_ready(outs32)
    ref = _reference(feat, label, centers, log_covs, alpha)
    for got, want in zip(outs32, ref):
        np.testing.assert_allclose(np.asarray(got), np.asarray(want),
                                   rtol=5e-3, atol=5e-3)

    # --- default bf16-MXU path: shape / finiteness sanity ---
    outs = lgm_loss_forward(feat, label, centers, log_covs, alpha)
    outs = jax.block_until_ready(outs)
    logits, margin_logits, likelihood, cdist, reg = outs
    assert logits.shape == (B, C) and margin_logits.shape == (B, C)
    assert likelihood.shape == () and cdist.shape == () and reg.shape == ()
    assert bool(jnp.all(jnp.isfinite(logits)))
    assert bool(jnp.all(jnp.isfinite(margin_logits)))

    print("KERNEL_OK")
</pallas_src>

<mosaic_0001>
module attributes {stable_mosaic.version = 11 : i64} {
  func.func @_lgm_kernel(%arg0: i32, %arg1: memref<8x128xf32, #tpu.memory_space<vmem>>, %arg2: memref<8x1xi32, #tpu.memory_space<vmem>>, %arg3: memref<8x1xf32, #tpu.memory_space<vmem>>, %arg4: memref<128x128xf32, #tpu.memory_space<vmem>>, %arg5: memref<128x128xf32, #tpu.memory_space<vmem>>, %arg6: memref<1x128xf32, #tpu.memory_space<vmem>>, %arg7: memref<8x128xf32, #tpu.memory_space<vmem>>, %arg8: memref<8x128xf32, #tpu.memory_space<vmem>>) attributes {dimension_semantics = [#tpu.dimension_semantics<parallel>], iteration_bounds = array<i64: 1>, scalar_prefetch = 0 : i64, scratch_operands = 0 : i64, tpu.core_type = #tpu.core_type<tc>, window_params = [{transform_indices = @transform_0, window_bounds = array<i64: 8, 128>}, {transform_indices = @transform_1, window_bounds = array<i64: 8, 1>}, {transform_indices = @transform_2, window_bounds = array<i64: 8, 1>}, {pipeline_mode = #tpu.pipeline_mode<synchronous>, transform_indices = @transform_3, window_bounds = array<i64: 128, 128>}, {pipeline_mode = #tpu.pipeline_mode<synchronous>, transform_indices = @transform_4, window_bounds = array<i64: 128, 128>}, {pipeline_mode = #tpu.pipeline_mode<synchronous>, transform_indices = @transform_5, window_bounds = array<i64: 1, 128>}, {transform_indices = @transform_6, window_bounds = array<i64: 8, 128>}, {transform_indices = @transform_7, window_bounds = array<i64: 8, 128>}]} {
    %c0 = arith.constant 0 : index
    %c0_0 = arith.constant 0 : index
    %0 = vector.load %arg1[%c0, %c0_0] : memref<8x128xf32, #tpu.memory_space<vmem>>, vector<8x128xf32>
    %c0_1 = arith.constant 0 : index
    %c0_2 = arith.constant 0 : index
    %1 = vector.load %arg2[%c0_1, %c0_2] : memref<8x1xi32, #tpu.memory_space<vmem>>, vector<8x1xi32>
    %c0_3 = arith.constant 0 : index
    %c0_4 = arith.constant 0 : index
    %2 = vector.load %arg3[%c0_3, %c0_4] : memref<8x1xf32, #tpu.memory_space<vmem>>, vector<8x1xf32>
    %c0_5 = arith.constant 0 : index
    %c0_6 = arith.constant 0 : index
    %3 = vector.load %arg6[%c0_5, %c0_6] : memref<1x128xf32, #tpu.memory_space<vmem>>, vector<1x128xf32>
    %4 = arith.mulf %0, %0 : vector<8x128xf32>
    %c0_7 = arith.constant 0 : index
    %c0_8 = arith.constant 0 : index
    %5 = vector.load %arg4[%c0_7, %c0_8] : memref<128x128xf32, #tpu.memory_space<vmem>>, vector<128x128xf32>
    %cst = arith.constant dense<0.000000e+00> : vector<8x128xf32>
    %6 = tpu.matmul %4, %5, %cst {dimension_numbers = #tpu.dot_dimension_numbers<[1], [0], [0], [1], [0, 0, 1, 1], [], []>} : vector<8x128xf32>, vector<128x128xf32>, vector<8x128xf32> -> vector<8x128xf32>
    %c0_9 = arith.constant 0 : index
    %c0_10 = arith.constant 0 : index
    %7 = vector.load %arg5[%c0_9, %c0_10] : memref<128x128xf32, #tpu.memory_space<vmem>>, vector<128x128xf32>
    %cst_11 = arith.constant dense<0.000000e+00> : vector<8x128xf32>
    %8 = tpu.matmul %0, %7, %cst_11 {dimension_numbers = #tpu.dot_dimension_numbers<[1], [0], [0], [1], [0, 0, 1, 1], [], []>} : vector<8x128xf32>, vector<128x128xf32>, vector<8x128xf32> -> vector<8x128xf32>
    %9 = arith.addf %6, %8 : vector<8x128xf32>
    %10 = vector.broadcast %3 : vector<1x128xf32> to vector<8x128xf32>
    %11 = arith.addf %9, %10 : vector<8x128xf32>
    %12 = tpu.iota {dimensions = array<i32: 1>} : vector<8x128xi32>
    %13 = vector.broadcast %1 : vector<8x1xi32> to vector<8x128xi32>
    %14 = arith.cmpi eq, %12, %13 : vector<8x128xi32>
    %cst_12 = arith.constant 0xFF800000 : f32
    %15 = vector.broadcast %cst_12 : f32 to vector<8x128xf32>
    %16 = arith.select %14, %15, %11 : vector<8x128xi1>, vector<8x128xf32>
    %cst_13 = arith.constant dense<0xFF800000> : vector<8xf32>
    %17 = vector.multi_reduction <maximumf>, %16, %cst_13 [1] : vector<8x128xf32> to vector<8xf32>
    %18 = vector.shape_cast %17 : vector<8xf32> to vector<8x1xf32>
    %19 = vector.broadcast %18 : vector<8x1xf32> to vector<8x128xf32>
    %20 = arith.subf %16, %19 : vector<8x128xf32>
    %21 = math.exp %20 : vector<8x128xf32>
    %cst_14 = arith.constant dense<0.000000e+00> : vector<8xf32>
    %22 = vector.multi_reduction <add>, %21, %cst_14 [1] : vector<8x128xf32> to vector<8xf32>
    %23 = vector.shape_cast %22 : vector<8xf32> to vector<8x1xf32>
    %24 = math.log %23 : vector<8x1xf32>
    %cst_15 = arith.constant 0.000000e+00 : f32
    %25 = vector.broadcast %cst_15 : f32 to vector<8x128xf32>
    %26 = arith.select %14, %11, %25 : vector<8x128xi1>, vector<8x128xf32>
    %cst_16 = arith.constant dense<0.000000e+00> : vector<8xf32>
    %27 = vector.multi_reduction <add>, %26, %cst_16 [1] : vector<8x128xf32> to vector<8xf32>
    %28 = vector.shape_cast %27 : vector<8xf32> to vector<8x1xf32>
    %cst_17 = arith.constant 2.000000e+00 : f32
    %29 = vector.broadcast %cst_17 : f32 to vector<8x1xf32>
    %30 = arith.mulf %29, %28 : vector<8x1xf32>
    %cst_18 = arith.constant 5.000000e-01 : f32
    %31 = vector.broadcast %cst_18 : f32 to vector<8x1xf32>
    %32 = arith.mulf %31, %2 : vector<8x1xf32>
    %33 = arith.addf %30, %32 : vector<8x1xf32>
    %34 = vector.shape_cast %33 : vector<8x1xf32> to vector<8x1xf32>
    %35 = vector.broadcast %34 : vector<8x1xf32> to vector<8x128xf32>
    %36 = arith.select %14, %35, %11 : vector<8x128xi1>, vector<8x128xf32>
    %37 = arith.maximumf %18, %28 : vector<8x1xf32>
    %38 = vector.broadcast %37 : vector<8x1xf32> to vector<8x128xf32>
    %39 = arith.subf %11, %38 : vector<8x128xf32>
    %40 = arith.subf %18, %37 : vector<8x1xf32>
    %41 = arith.addf %40, %24 : vector<8x1xf32>
    %42 = arith.subf %28, %37 : vector<8x1xf32>
    %43 = arith.maximumf %41, %42 : vector<8x1xf32>
    %44 = arith.subf %41, %43 : vector<8x1xf32>
    %45 = math.exp %44 : vector<8x1xf32>
    %46 = arith.subf %42, %43 : vector<8x1xf32>
    %47 = math.exp %46 : vector<8x1xf32>
    %48 = arith.addf %45, %47 : vector<8x1xf32>
    %49 = math.log %48 : vector<8x1xf32>
    %50 = arith.addf %43, %49 : vector<8x1xf32>
    %51 = vector.broadcast %50 : vector<8x1xf32> to vector<8x128xf32>
    %52 = arith.subf %39, %51 : vector<8x128xf32>
    %c0_19 = arith.constant 0 : index
    %c0_20 = arith.constant 0 : index
    %53 = vector.load %arg7[%c0_19, %c0_20] : memref<8x128xf32, #tpu.memory_space<vmem>>, vector<8x128xf32>
    tpu.vector_store %arg7[%c0_19, %c0_20], %52 {strides = array<i32>} : memref<8x128xf32, #tpu.memory_space<vmem>>, vector<8x128xf32>,
    %54 = arith.maximumf %18, %33 : vector<8x1xf32>
    %55 = vector.broadcast %54 : vector<8x1xf32> to vector<8x128xf32>
    %56 = arith.subf %36, %55 : vector<8x128xf32>
    %57 = arith.subf %18, %54 : vector<8x1xf32>
    %58 = arith.addf %57, %24 : vector<8x1xf32>
    %59 = arith.subf %33, %54 : vector<8x1xf32>
    %60 = arith.maximumf %58, %59 : vector<8x1xf32>
    %61 = arith.subf %58, %60 : vector<8x1xf32>
    %62 = math.exp %61 : vector<8x1xf32>
    %63 = arith.subf %59, %60 : vector<8x1xf32>
    %64 = math.exp %63 : vector<8x1xf32>
    %65 = arith.addf %62, %64 : vector<8x1xf32>
    %66 = math.log %65 : vector<8x1xf32>
    %67 = arith.addf %60, %66 : vector<8x1xf32>
    %68 = vector.broadcast %67 : vector<8x1xf32> to vector<8x128xf32>
    %69 = arith.subf %56, %68 : vector<8x128xf32>
    %c0_21 = arith.constant 0 : index
    %c0_22 = arith.constant 0 : index
    %70 = vector.load %arg8[%c0_21, %c0_22] : memref<8x128xf32, #tpu.memory_space<vmem>>, vector<8x128xf32>
    tpu.vector_store %arg8[%c0_21, %c0_22], %69 {strides = array<i32>} : memref<8x128xf32, #tpu.memory_space<vmem>>, vector<8x128xf32>,
    return
  }
  func.func @transform_0(%arg0: i32) -> (i32, i32) {
    %c0_i32 = arith.constant 0 : i32
    %c0_i32_0 = arith.constant 0 : i32
    return %arg0, %c0_i32 : i32, i32
  }
  func.func @transform_1(%arg0: i32) -> (i32, i32) {
    %c0_i32 = arith.constant 0 : i32
    %c0_i32_0 = arith.constant 0 : i32
    return %arg0, %c0_i32 : i32, i32
  }
  func.func @transform_2(%arg0: i32) -> (i32, i32) {
    %c0_i32 = arith.constant 0 : i32
    %c0_i32_0 = arith.constant 0 : i32
    return %arg0, %c0_i32 : i32, i32
  }
  func.func @transform_3(%arg0: i32) -> (i32, i32) {
    %c0_i32 = arith.constant 0 : i32
    %c0_i32_0 = arith.constant 0 : i32
    %c0_i32_1 = arith.constant 0 : i32
    return %c0_i32, %c0_i32_0 : i32, i32
  }
  func.func @transform_4(%arg0: i32) -> (i32, i32) {
    %c0_i32 = arith.constant 0 : i32
    %c0_i32_0 = arith.constant 0 : i32
    %c0_i32_1 = arith.constant 0 : i32
    return %c0_i32, %c0_i32_0 : i32, i32
  }
  func.func @transform_5(%arg0: i32) -> (i32, i32) {
    %c0_i32 = arith.constant 0 : i32
    %c0_i32_0 = arith.constant 0 : i32
    %c0_i32_1 = arith.constant 0 : i32
    return %c0_i32, %c0_i32_0 : i32, i32
  }
  func.func @transform_6(%arg0: i32) -> (i32, i32) {
    %c0_i32 = arith.constant 0 : i32
    %c0_i32_0 = arith.constant 0 : i32
    return %arg0, %c0_i32 : i32, i32
  }
  func.func @transform_7(%arg0: i32) -> (i32, i32) {
    %c0_i32 = arith.constant 0 : i32
    %c0_i32_0 = arith.constant 0 : i32
    return %arg0, %c0_i32 : i32, i32
  }
}

</mosaic_0001>

<bundles_post_ra>
// kernel: tpu_custom_call.1
= control target key start
LH: loop header
LB: loop body
LE: loop exit
PB: predicated region body
PF: predicated region fallthrough
CT: control target
= control target key end

     0   :  { %13 = vsyncpa [#allocation3], 0  ;;  %s767_s0 = inlined_call_operand.vmem [shape: f32[8,128], index: 0, kind: input, shape index: {}]   ;;  %s768_s1 = inlined_call_operand.vmem [shape: s32[8,1], index: 1, kind: input, shape index: {}]   ;;  %s769_s2 = inlined_call_operand.vmem [shape: f32[8,1], index: 2, kind: input, shape index: {}]   ;;  %s770_s3 = inlined_call_operand.hbm [shape: f32[128,128], index: 3, kind: input, shape index: {}]   ;;  %s771_s4 = inlined_call_operand.hbm [shape: f32[128,128], index: 4, kind: input, shape index: {}]   ;;  %s772_s5 = inlined_call_operand.vmem [shape: f32[1,128], index: 5, kind: input, shape index: {}]   ;;  %s773_s6 = inlined_call_operand.hbm [shape: f32[8,128], index: 6, kind: output, shape index: {0}]   ;;  %s774_s7 = inlined_call_operand.hbm [shape: f32[8,128], index: 7, kind: output, shape index: {1}]  }
   0x1   :  { %14 = vsyncpa [#allocation6], 0 }
   0x2   :  { %15 = vsyncpa [#allocation4], 0 }
   0x3   :  { %16 = vsyncpa [#allocation9], 0  ;;  %s620_s24 = smov [#allocation2]   ;;  %s524_s28 = scalar_lea.hbm %s770_s3, 2048 }
   0x4   :  { %s28_s25 = sshll.u32 %s620_s24, 4  ;;  %p525_p0 = scmp.ne.s32.totalorder %s770_s3, %s524_s28  ;;  %s29_s25 = int_to_ptr.vmem [resolvable:$true] %s28_s25 }
   0x5   :  { %p528_p1 = scmp.lt.u32.totalorder %s524_s28, %s770_s3 }
   0x7   :  { %p530_p2 = pnand %p528_p1, %p525_p0 }
   0x9   :  { %533 = shalt.err (!%p530_p2)
}
   0xa   :  { %s534_s10 = scalar_lea.vmem %s29_s25, 2048  ;;  %p539_p4 = scmp.lt.s32.totalorder %s29_s25, %s29_s25 }
   0xb   :  { %p535_p3 = scmp.ne.s32.totalorder %s29_s25, %s534_s10  ;;  %p540_p5 = scmp.lt.s32.totalorder %s534_s10, %s534_s10 }
   0xd   :  { %p541_p6 = por %p540_p5, %p539_p4 }
   0xf   :  { %p542_p7 = pnand %p541_p6, %p535_p3 }
  0x11   :  { %545 = shalt.err (!%p542_p7)
}
  0x12   :  { %s621_s11 = smov 128   ;;  %s622_s12 = smov 8  }
  0x13   :  { %34 = dma.hbm_to_vmem [thread:$0]  %s770_s3, 2048, %s29_s25, [#allocation3], %s621_s11, %s621_s11, %s622_s12  }
  0x14   :  { %s623_s15 = smov [#allocation5]   ;;  %s546_s19 = scalar_lea.hbm %s771_s4, 2048 }
  0x15   :  { %s40_s16 = sshll.u32 %s623_s15, 4  ;;  %p547_p8 = scmp.ne.s32.totalorder %s771_s4, %s546_s19  ;;  %s41_s16 = int_to_ptr.vmem [resolvable:$true] %s40_s16 }
  0x16   :  { %p550_p9 = scmp.lt.u32.totalorder %s546_s19, %s771_s4 }
  0x18   :  { %p552_p10 = pnand %p550_p9, %p547_p8 }
  0x1a   :  { %555 = shalt.err (!%p552_p10)
}
  0x1b   :  { %s556_s24 = scalar_lea.vmem %s41_s16, 2048  ;;  %p561_p12 = scmp.lt.s32.totalorder %s41_s16, %s41_s16 }
  0x1c   :  { %p557_p11 = scmp.ne.s32.totalorder %s41_s16, %s556_s24  ;;  %p562_p13 = scmp.lt.s32.totalorder %s556_s24, %s556_s24 }
  0x1e   :  { %p563_p0 = por %p562_p13, %p561_p12 }
  0x20   :  { %p564_p1 = pnand %p563_p0, %p557_p11 }
  0x22   :  { %567 = shalt.err (!%p564_p1)
}
  0x23   :  { %46 = dma.hbm_to_vmem [thread:$0]  %s771_s4, 2048, %s41_s16, [#allocation6], %s621_s11, %s621_s11, %s622_s12  }
  0x24   :  { %612 = dma.done.wait [#allocation3], 2048  }
  0x25   :  { %613 = vsyncadd [#allocation3], 4294965248 }
  0x26   :  { %614 = dma.done.wait [#allocation6], 2048  }
  0x27   :  { %615 = vsyncadd [#allocation6], 4294965248  ;;  %v624_v0 = vmov 0.0|0.0   ;;  %vm625_vm0 = vmmov 0   ;;  %v626_v1 = vmov 0.0   ;;  %v627_v2 = vmov 0  }
  0x28   :  { %448 = vmatprep.subr.bf16.mxu0 %v624_v0  ;;  %472 = vmatprep.subr.bf16.mxu1 %v624_v0  ;;  %v76_v3 = vld [vmem:[#allocation5] sm:$0xff]  ;;  %v77_v4 = vld [vmem:[#allocation5 + $0x8] sm:$0xff]  ;;  %v78_v8 = vld [vmem:[#allocation5 + $0x10] sm:$0xff]  ;;  %v239_v54 = vlaneseq }
  0x29   :  { %410 = vmatprep.mubr.msk.f32.mxu0 %vm625_vm0, %v626_v1  ;;  %445 = vmatprep.mubr.msk.f32.mxu1 %vm625_vm0, %v626_v1  ;;  %v60_v5 = vld [vmem:[#allocation2] sm:$0xff]  ;;  %v449_v6 = vpack.c.bf16 %v77_v4, %v76_v3  ;;  %v61_v7 = vld [vmem:[#allocation2 + $0x8] sm:$0xff]  ;;  %v79_v9 = vld [vmem:[#allocation5 + $0x18] sm:$0xff] }
  0x2a   :  { %506 = vset.pattern.permute.xlu0 %v627_v2  ;;  %507 = vset.pattern.permute.xlu1 %v627_v2  ;;  %v473_v10 = vpack.c.bf16 %v61_v7, %v60_v5  ;;  %v62_v11 = vld [vmem:[#allocation2 + $0x10] sm:$0xff]  ;;  %v63_v12 = vld [vmem:[#allocation2 + $0x18] sm:$0xff]  ;;  %v452_v13 = vpack.c.bf16 %v79_v9, %v78_v8  ;;  %v80_v15 = vld [vmem:[#allocation5 + $0x20] sm:$0xff]  ;;  %v716_v55 = vand.u32 127, %v239_v54 }
  0x2b   :  { %450 = vmatpush3.bf16.msra.mxu0 %v449_v6  ;;  %v476_v14 = vpack.c.bf16 %v63_v12, %v62_v11  ;;  %v81_v16 = vld [vmem:[#allocation5 + $0x28] sm:$0xff]  ;;  %v64_v17 = vld [vmem:[#allocation2 + $0x20] sm:$0xff]  ;;  %v82_v21 = vld [vmem:[#allocation5 + $0x30] sm:$0xff] }
  0x2c   :  { %474 = vmatpush3.bf16.msra.mxu1 %v473_v10  ;;  %451 = vmatprep.subr.bf16.mxu0 %v624_v0  ;;  %v65_v18 = vld [vmem:[#allocation2 + $0x28] sm:$0xff]  ;;  %v455_v19 = vpack.c.bf16 %v81_v16, %v80_v15  ;;  %v83_v22 = vld [vmem:[#allocation5 + $0x38] sm:$0xff]  ;;  %v66_v23 = vld [vmem:[#allocation2 + $0x30] sm:$0xff] }
  0x2d   :  { %475 = vmatprep.subr.bf16.mxu1 %v624_v0  ;;  %v479_v20 = vpack.c.bf16 %v65_v18, %v64_v17  ;;  %v67_v24 = vld [vmem:[#allocation2 + $0x38] sm:$0xff]  ;;  %v458_v25 = vpack.c.bf16 %v83_v22, %v82_v21  ;;  %v56_v26 = vld [vmem:[%s768_s1] sm:$0xff]  ;;  %v85_v29 = vld [vmem:[#allocation5 + $0x48] sm:$0xff] }
  0x2e   :  { %v482_v27 = vpack.c.bf16 %v67_v24, %v66_v23  ;;  %v84_v28 = vld [vmem:[#allocation5 + $0x40] sm:$0xff]  ;;  %v69_v31 = vld [vmem:[#allocation2 + $0x48] sm:$0xff]  ;;  %242 = vperm.xlu0 %506, %v56_v26   ;;  %v86_v34 = vld [vmem:[#allocation5 + $0x50] sm:$0xff] }
  0x2f   :  { %453 = vmatpush3.bf16.msra.mxu0 %v452_v13  ;;  %v68_v30 = vld [vmem:[#allocation2 + $0x40] sm:$0xff]  ;;  %v461_v32 = vpack.c.bf16 %v85_v29, %v84_v28  ;;  %v87_v35 = vld [vmem:[#allocation5 + $0x58] sm:$0xff]  ;;  %v70_v36 = vld [vmem:[#allocation2 + $0x50] sm:$0xff] }
  0x30   :  { %477 = vmatpush3.bf16.msra.mxu1 %v476_v14  ;;  %454 = vmatprep.subr.bf16.mxu0 %v624_v0  ;;  %v485_v33 = vpack.c.bf16 %v69_v31, %v68_v30  ;;  %v71_v37 = vld [vmem:[#allocation2 + $0x58] sm:$0xff]  ;;  %v464_v38 = vpack.c.bf16 %v87_v35, %v86_v34  ;;  %v88_v40 = vld [vmem:[#allocation5 + $0x60] sm:$0xff]  ;;  %v89_v41 = vld [vmem:[#allocation5 + $0x68] sm:$0xff] }
  0x31   :  { %478 = vmatprep.subr.bf16.mxu1 %v624_v0  ;;  %v488_v39 = vpack.c.bf16 %v71_v37, %v70_v36  ;;  %v72_v42 = vld [vmem:[#allocation2 + $0x60] sm:$0xff]  ;;  %v73_v43 = vld [vmem:[#allocation2 + $0x68] sm:$0xff]  ;;  %v467_v44 = vpack.c.bf16 %v89_v41, %v88_v40  ;;  %v90_v46 = vld [vmem:[#allocation5 + $0x70] sm:$0xff] }
  0x32   :  { %v491_v45 = vpack.c.bf16 %v73_v43, %v72_v42  ;;  %v91_v47 = vld [vmem:[#allocation5 + $0x78] sm:$0xff]  ;;  %v74_v48 = vld [vmem:[#allocation2 + $0x70] sm:$0xff]  ;;  %v55_v52 = vld [vmem:[%s767_s0] sm:$0xff] }
  0x33   :  { %456 = vmatpush3.bf16.msra.mxu0 %v455_v19  ;;  %v75_v49 = vld [vmem:[#allocation2 + $0x78] sm:$0xff]  ;;  %v470_v50 = vpack.c.bf16 %v91_v47, %v90_v46  ;;  %v59_v53 = vmul.f32 %v55_v52, %v55_v52  ;;  %v343_v58 = vld [vmem:[%s772_s5] ss:$0 sm:$0xff] }
  0x34   :  { %480 = vmatpush3.bf16.msra.mxu1 %v479_v20  ;;  %457 = vmatprep.subr.bf16.mxu0 %v624_v0  ;;  %v494_v51 = vpack.c.bf16 %v75_v49, %v74_v48  ;;  %v57_v7 = vld [vmem:[%s769_s2] sm:$0xff]  ;;  %s628_s2 = smov [#allocation7]  }
  0x35   :  { %481 = vmatprep.subr.bf16.mxu1 %v624_v0  ;;  %v259_v8 = vmul.f32 0.5, %v57_v7  ;;  %s319_s30 = sshll.u32 %s628_s2, 4  ;;  %s320_s30 = int_to_ptr.vmem [resolvable:$true] %s319_s30 }
  0x36   :  { %s568_s8 = scalar_lea.vmem %s320_s30, 128  ;;  %p573_p3 = scmp.lt.s32.totalorder %s320_s30, %s320_s30 }
  0x37   :  { %459 = vmatpush3.bf16.msra.mxu0 %v458_v25  ;;  %p569_p2 = scmp.ne.s32.totalorder %s320_s30, %s568_s8  ;;  %p574_p4 = scmp.lt.s32.totalorder %s568_s8, %s568_s8 }
  0x38   :  { %483 = vmatpush3.bf16.msra.mxu1 %v482_v27  ;;  %460 = vmatprep.subr.bf16.mxu0 %v624_v0 }
  0x39   :  { %484 = vmatprep.subr.bf16.mxu1 %v624_v0  ;;  %p575_p5 = por %p574_p4, %p573_p3 }
  0x3b   :  { %462 = vmatpush3.bf16.msra.mxu0 %v461_v32  ;;  %p576_p6 = pnand %p575_p5, %p569_p2 }
  0x3c   :  { %486 = vmatpush3.bf16.msra.mxu1 %v485_v33  ;;  %463 = vmatprep.subr.bf16.mxu0 %v624_v0 }
  0x3d   :  { %487 = vmatprep.subr.bf16.mxu1 %v624_v0 }
  0x3f   :  { %465 = vmatpush3.bf16.msra.mxu0 %v464_v38 }
  0x40   :  { %489 = vmatpush3.bf16.msra.mxu1 %v488_v39  ;;  %466 = vmatprep.subr.bf16.mxu0 %v624_v0 }
  0x41   :  { %490 = vmatprep.subr.bf16.mxu1 %v624_v0 }
  0x43   :  { %468 = vmatpush3.bf16.msra.mxu0 %v467_v44 }
  0x44   :  { %492 = vmatpush3.bf16.msra.mxu1 %v491_v45  ;;  %469 = vmatprep.subr.bf16.mxu0 %v624_v0 }
  0x45   :  { %493 = vmatprep.subr.bf16.mxu1 %v624_v0 }
  0x47   :  { %471 = vmatpush3.bf16.msra.mxu0 %v470_v50 }
  0x48   :  { %495 = vmatpush3.bf16.msra.mxu1 %v494_v51 }
  0x4a   :  { %411 = vmatmul.mubr.f32.vlgmr.msra.gmra.mrb[0].mxu0 %v55_v52 }
  0x4b   :  { %446 = vmatmul.mubr.f32.vlgmr.msra.gmra.mrb[0].mxu1 %v59_v53 }
  0xad   :  { %v718_v57 = vpop.permute.xlu0 %242 }
  0xae   :  { %vm244_vm1 = vcmp.eq.s32.totalorder %v716_v55, %v718_v57 }
 0x11d   :  { %v158_v56 = vpop.f32.mrb[0].mxu0 }
 0x11e   :  { %v228_v59 = vpop.f32.mrb[0].mxu1  ;;  %v412_v60 = vpop.f32.mrb[1].mxu0 }
 0x11f   :  { %v229_v61 = vadd.f32 %v228_v59, %v158_v56  ;;  %v447_v62 = vpop.f32.mrb[1].mxu1 }
 0x121   :  { %v725_v63 = vadd.f32 %v343_v58, %v229_v61 }
 0x123   :  { %v245_v0 = vsel %vm244_vm1, -inf, %v725_v63  ;;  %v255_v5 = vsel %vm244_vm1, %v725_v63, 0.0 }
 0x124   :  { %246 = vmax.xlane.f32.xlu0 %v245_v0 }
 0x1b1   :  { %v247_v1 = vpop.xlane.xlu0 %246 }
 0x1b2   :  { %v248_v2 = vsub.f32 %v245_v0, %v247_v1 }
 0x1b4   :  { %v249_v3 = vmul.f32 1.442695, %v248_v2 }
 0x1b6   :  { %508 = vpow2.f32 %v249_v3 }
 0x1c0   :  { %v509_v4 = vpop.eup %508 }
 0x1c1   :  { %251 = vadd.xlane.f32.xlu1 %v509_v4 }
 0x1c5   :  { %256 = vadd.xlane.f32.xlu1 %v255_v5 }
 0x24e   :  { %v252_v6 = vpop.xlane.xlu1 %251 }
 0x24f   :  { %510 = vlog2.f32 %v252_v6 }
 0x252   :  { %v257_v9 = vpop.xlane.xlu1 %256 }
 0x253   :  { %v258_v10 = vmul.f32 2.0, %v257_v9  ;;  %v267_v12 = vmax.f32 %v247_v1, %v257_v9 }
 0x255   :  { %v260_v11 = vadd.f32 %v259_v8, %v258_v10  ;;  %v269_v17 = vsub.f32 %v247_v1, %v267_v12  ;;  %v271_v19 = vsub.f32 %v257_v9, %v267_v12  ;;  %v268_v42 = vsub.f32 %v725_v63, %v267_v12 }
 0x257   :  { %263 = vperm.xlu1 %507, %v260_v11   ;;  %v285_v13 = vmax.f32 %v247_v1, %v260_v11 }
 0x259   :  { %v511_v14 = vpop.eup %510  ;;  %v292_v15 = vsub.f32 %v247_v1, %v285_v13  ;;  %v294_v20 = vsub.f32 %v260_v11, %v285_v13 }
 0x25a   :  { %v254_v16 = vmul.f32 0.6931472, %v511_v14 }
 0x25b   :  { %288 = vperm.xlu1 %507, %v285_v13  }
 0x25c   :  { %v270_v18 = vadd.f32 %v269_v17, %v254_v16  ;;  %v293_v21 = vadd.f32 %v292_v15, %v254_v16 }
 0x25e   :  { %v272_v22 = vmax.f32 %v270_v18, %v271_v19  ;;  %v295_v23 = vmax.f32 %v293_v21, %v294_v20 }
 0x260   :  { %v273_v24 = vsub.f32 %v270_v18, %v272_v22  ;;  %v276_v25 = vsub.f32 %v271_v19, %v272_v22  ;;  %v296_v26 = vsub.f32 %v293_v21, %v295_v23  ;;  %v299_v27 = vsub.f32 %v294_v20, %v295_v23 }
 0x262   :  { %v274_v28 = vmul.f32 1.442695, %v273_v24  ;;  %v277_v29 = vmul.f32 1.442695, %v276_v25  ;;  %v297_v30 = vmul.f32 1.442695, %v296_v26 }
 0x263   :  { %v300_v31 = vmul.f32 1.442695, %v299_v27 }
 0x264   :  { %512 = vpow2.f32 %v274_v28 }
 0x265   :  { %514 = vpow2.f32 %v277_v29 }
 0x266   :  { %516 = vpow2.f32 %v297_v30 }
 0x267   :  { %518 = vpow2.f32 %v300_v31 }
 0x26e   :  { %v513_v32 = vpop.eup %512 }
 0x26f   :  { %v515_v33 = vpop.eup %514 }
 0x270   :  { %v517_v34 = vpop.eup %516  ;;  %v279_v35 = vadd.f32 %v515_v33, %v513_v32 }
 0x271   :  { %v519_v36 = vpop.eup %518 }
 0x272   :  { %v302_v37 = vadd.f32 %v519_v36, %v517_v34  ;;  %520 = vlog2.f32 %v279_v35 }
 0x274   :  { %522 = vlog2.f32 %v302_v37 }
 0x27c   :  { %v521_v38 = vpop.eup %520 }
 0x27d   :  { %v281_v39 = vmul.f32 0.6931472, %v521_v38 }
 0x27e   :  { %v523_v40 = vpop.eup %522 }
 0x27f   :  { %v304_v41 = vmul.f32 0.6931472, %v523_v40  ;;  %v282_v43 = vadd.f32 %v281_v39, %v272_v22 }
 0x281   :  { %v305_v44 = vadd.f32 %v304_v41, %v295_v23  ;;  %v283_v45 = vsub.f32 %v268_v42, %v282_v43 }
 0x283   :  { %308 = vperm.xlu1 %507, %v305_v44   ;;  %284 = vst [vmem:[#allocation7] sm:$0xff] %v283_v45 }
 0x284   :  { %579 = shalt.err (!%p576_p6)
}
 0x285   :  { %s580_s11 = scalar_lea.hbm %s773_s6, 128 }
 0x286   :  { %p581_p7 = scmp.ne.s32.totalorder %s773_s6, %s580_s11  ;;  %p584_p8 = scmp.lt.u32.totalorder %s580_s11, %s773_s6 }
 0x288   :  { %p586_p9 = pnand %p584_p8, %p581_p7 }
 0x28a   :  { %589 = shalt.err (!%p586_p9)
}
 0x28b   :  { %322 = dma.vmem_to_hbm [thread:$0]  %s320_s30, 128, %s773_s6, [#allocation4]  }
 0x28c   :  { %s629_s18 = smov [#allocation8]  }
 0x28d   :  { %s329_s19 = sshll.u32 %s629_s18, 4  ;;  %s330_s19 = int_to_ptr.vmem [resolvable:$true] %s329_s19 }
 0x28e   :  { %s590_s20 = scalar_lea.vmem %s330_s19, 128  ;;  %p595_p11 = scmp.lt.s32.totalorder %s330_s19, %s330_s19 }
 0x28f   :  { %p591_p10 = scmp.ne.s32.totalorder %s330_s19, %s590_s20  ;;  %p596_p12 = scmp.lt.s32.totalorder %s590_s20, %s590_s20 }
 0x291   :  { %p597_p13 = por %p596_p12, %p595_p11 }
 0x293   :  { %p598_p0 = pnand %p597_p13, %p591_p10 }
 0x2d6   :  { %v264_v46 = vpop.permute.xlu1 %263 }
 0x2d7   :  { %v266_v48 = vsel %vm244_vm1, %v264_v46, %v725_v63 }
 0x2da   :  { %v289_v47 = vpop.permute.xlu1 %288 }
 0x2db   :  { %v291_v49 = vsub.f32 %v266_v48, %v289_v47 }
 0x302   :  { %v309_v50 = vpop.permute.xlu1 %308 }
 0x303   :  { %v311_v51 = vsub.f32 %v291_v49, %v309_v50 }
 0x305   :  { %312 = vst [vmem:[#allocation8] sm:$0xff] %v311_v51 }
 0x306   :  { %601 = shalt.err (!%p598_p0)
}
 0x307   :  { %s602_s22 = scalar_lea.hbm %s774_s7, 128 }
 0x308   :  { %p603_p1 = scmp.ne.s32.totalorder %s774_s7, %s602_s22  ;;  %p606_p2 = scmp.lt.u32.totalorder %s602_s22, %s774_s7 }
 0x30a   :  { %p608_p3 = pnand %p606_p2, %p603_p1 }
 0x30c   :  { %611 = shalt.err (!%p608_p3)
}
 0x30d   :  { %332 = dma.vmem_to_hbm [thread:$0]  %s330_s19, 128, %s774_s7, [#allocation9]  }
 0x30e   :  { %616 = dma.done.wait [#allocation4], 128  }
 0x30f   :  { %617 = vsyncadd [#allocation4], 4294967168 }
 0x310   :  { %618 = dma.done.wait [#allocation9], 128  }
 0x311   :  { %619 = vsyncadd [#allocation9], 4294967168 }
 0x312   :  { %339 = vsyncpa [#allocation3], 1 }
 0x313   :  { %340 = vsyncpa [#allocation6], 1 }
 0x314   :  { %341 = vsyncpa [#allocation4], 1 }
 0x315   :  { %342 = vsyncpa [#allocation9], 1 }

</bundles_post_ra>
